<compile_context>
chip_gen: v6e
topology: v6e:2x2x1
jax: 0.10.0
libtpu: 0.0.40
codegen_flags: <defaults>
</compile_context>

<pallas_src>
import functools

import jax
import jax.numpy as jnp
from jax.experimental import pallas as pl
from jax.experimental.pallas import tpu as pltpu


def _layernorm_kernel(x_ref, ab_ref, o_ref, *, features, groups, eps):
    """Normalizes `groups` logical rows packed along the 128-lane axis of each physical row."""
    x = x_ref[...].astype(jnp.float32)      # (tile_rows, groups*features)
    ab = ab_ref[...]                        # (2, groups*features) float32: row0=a_2, row1=b_2 (tiled)
    a = ab[0:1, :]
    b = ab[1:2, :]

    outs = []
    for k in range(groups):                 # static, tiny (groups <= 128//features)
        seg = x[:, k * features:(k + 1) * features]
        mean = jnp.mean(seg, axis=-1, keepdims=True)
        diff = seg - mean
        # torch.std default = unbiased (divide by N-1). Two-pass form kept for exactness
        # (the fused sum/sumsq variance risks cancellation vs the 1e-5 reference tolerance).
        var = jnp.sum(diff * diff, axis=-1, keepdims=True) / jnp.float32(features - 1)
        inv = 1.0 / (jnp.sqrt(var) + eps)   # narrow (tile_rows, 1) divide, broadcast multiply
        outs.append(diff * inv)
    y = outs[0] if groups == 1 else jnp.concatenate(outs, axis=-1)
    # Scale/shift applied at full lane width; store is lane-dense (unmasked) when groups*F==128.
    o_ref[...] = (y * a + b).astype(o_ref.dtype)


def _vmem_capacity_bytes():
    try:
        return int(pltpu.get_tpu_info().vmem_capacity_bytes)
    except Exception:
        return 64 * 1024 * 1024   # conservative fallback (v7x per-TensorCore VMEM)


def _choose_tile_rows(n_rows, row_bytes, sub, vmem_cap):
    """Byte-targeted row tile. 1-4 MiB of input tile amortizes the ~0.35us per-grid-step
    overhead on every generation; 4 live row tiles (double-buffered in + out) must sit well
    inside VMEM (64 MiB/TC on v7x, 128 MiB on v5e/v6e)."""
    # Whole problem small enough for a single block -> one grid step, no tail handling at all.
    if n_rows <= sub or n_rows * row_bytes <= (4 << 20):
        return int(n_rows)
    target = min(4 << 20, vmem_cap // 8)
    t = max(sub, (target // row_bytes) // sub * sub)
    t = min(t, (n_rows // sub) * sub)
    # Prefer a nearby exact divisor of n_rows so there is no ragged tail block.
    for cand in range(t, max(sub, t // 2) - 1, -sub):
        if n_rows % cand == 0:
            return int(cand)
    return int(t)   # ragged tail: Pallas clips the final block's writeback to the array bounds


def layer_norm(x, a_2, b_2, eps=1e-6, tile_rows=None):
    """LayerNorm over the last axis, matching the custom PyTorch module semantics."""
    orig_shape = x.shape
    features = orig_shape[-1]
    x2d = x.reshape(-1, features)           # free (row-major) metadata reshape
    n_rows = x2d.shape[0]

    # Lane-dense folding: pack `groups` original rows into the 128-lane axis when F < 128.
    groups = 1
    if features < 128 and 128 % features == 0:
        g = 128 // features
        while g > 1 and n_rows % g != 0:
            g //= 2
        groups = g
    width = groups * features
    n_fold = n_rows // groups
    if groups > 1:
        x2d = x2d.reshape(n_fold, width)     # still a free row-major reshape (no HBM copy)

    itemsize = jnp.dtype(x.dtype).itemsize
    sub = max(8, 32 // itemsize)             # sublane multiple: f32->8, bf16->16, int8->32
    vmem_cap = _vmem_capacity_bytes()
    row_bytes = width * itemsize
    if tile_rows is None:
        tile_rows = _choose_tile_rows(n_fold, row_bytes, sub, vmem_cap)

    # a_2 / b_2 kept in float32 (no precision round-trip through x.dtype), tiled across the
    # folded lane groups, merged into one (2, width) operand -> one DMA / one VMEM slot.
    ab = jnp.stack(
        [jnp.tile(a_2.reshape(features).astype(jnp.float32), groups),
         jnp.tile(b_2.reshape(features).astype(jnp.float32), groups)],
        axis=0)

    num_blocks = pl.cdiv(n_fold, tile_rows)
    block_bytes = tile_rows * row_bytes
    ab_bytes = 2 * width * 4
    # 2x double-buffered input tile + 2x output tile + ab + slack for intermediates.
    vmem_limit = int(min(max(4 * block_bytes + 2 * ab_bytes + (16 << 20), 32 << 20), vmem_cap))

    kernel = functools.partial(_layernorm_kernel, features=features, groups=groups, eps=eps)

    out = pl.pallas_call(
        kernel,
        out_shape=jax.ShapeDtypeStruct((n_fold, width), x.dtype),
        grid_spec=pltpu.PrefetchScalarGridSpec(
            num_scalar_prefetch=0,
            grid=(num_blocks,),
            in_specs=[
                pl.BlockSpec((tile_rows, width), lambda i: (i, 0)),
                pl.BlockSpec((2, width), lambda i: (0, 0)),
            ],
            out_specs=pl.BlockSpec((tile_rows, width), lambda i: (i, 0)),
        ),
        compiler_params=pltpu.CompilerParams(
            dimension_semantics=("parallel",),   # rows independent -> megacore sharding on v7x
            vmem_limit_bytes=vmem_limit,
        ),
    )(x2d, ab)

    return out.reshape(orig_shape)


if __name__ == "__main__":
    key = jax.random.PRNGKey(0)
    batch, seq, hidden = 2, 8, 32

    # Deterministic parameter init per the module's __init__: ones / zeros.
    a_2 = jnp.ones((hidden,), dtype=jnp.float32)
    b_2 = jnp.zeros((hidden,), dtype=jnp.float32)

    x = jax.random.normal(key, (batch, seq, hidden), dtype=jnp.float32)

    y = layer_norm(x, a_2, b_2, eps=1e-6)
    y = jax.block_until_ready(y)

    # Reference check in plain JAX (unbiased std, eps added to std — matches the torch module).
    mean = jnp.mean(x, axis=-1, keepdims=True)
    std = jnp.std(x, axis=-1, keepdims=True, ddof=1)
    y_ref = a_2 * (x - mean) / (std + 1e-6) + b_2
    assert jnp.allclose(y, y_ref, atol=1e-5, rtol=1e-5), "mismatch vs reference"

    print("KERNEL_OK")
</pallas_src>

<mosaic_0001>
module attributes {stable_mosaic.version = 11 : i64} {
  func.func @_layernorm_kernel(%arg0: i32, %arg1: memref<4x128xf32, #tpu.memory_space<vmem>>, %arg2: memref<2x128xf32, #tpu.memory_space<vmem>>, %arg3: memref<4x128xf32, #tpu.memory_space<vmem>>) attributes {dimension_semantics = [#tpu.dimension_semantics<parallel>], iteration_bounds = array<i64: 1>, scalar_prefetch = 0 : i64, scratch_operands = 0 : i64, tpu.core_type = #tpu.core_type<tc>, window_params = [{transform_indices = @transform_0, window_bounds = array<i64: 4, 128>}, {pipeline_mode = #tpu.pipeline_mode<synchronous>, transform_indices = @transform_1, window_bounds = array<i64: 2, 128>}, {transform_indices = @transform_2, window_bounds = array<i64: 4, 128>}]} {
    %c0 = arith.constant 0 : index
    %c0_0 = arith.constant 0 : index
    %0 = vector.load %arg1[%c0, %c0_0] : memref<4x128xf32, #tpu.memory_space<vmem>>, vector<4x128xf32>
    %c0_1 = arith.constant 0 : index
    %c0_2 = arith.constant 0 : index
    %1 = vector.load %arg2[%c0_1, %c0_2] : memref<2x128xf32, #tpu.memory_space<vmem>>, vector<2x128xf32>
    %2 = vector.extract_strided_slice %1 {offsets = [0, 0], sizes = [1, 128], strides = [1, 1]} : vector<2x128xf32> to vector<1x128xf32>
    %3 = vector.extract_strided_slice %1 {offsets = [1, 0], sizes = [1, 128], strides = [1, 1]} : vector<2x128xf32> to vector<1x128xf32>
    %4 = vector.extract_strided_slice %0 {offsets = [0, 0], sizes = [4, 32], strides = [1, 1]} : vector<4x128xf32> to vector<4x32xf32>
    %cst = arith.constant dense<0.000000e+00> : vector<4xf32>
    %5 = vector.multi_reduction <add>, %4, %cst [1] : vector<4x32xf32> to vector<4xf32>
    %6 = vector.shape_cast %5 : vector<4xf32> to vector<4x1xf32>
    %cst_3 = arith.constant 3.200000e+01 : f32
    %7 = vector.broadcast %cst_3 : f32 to vector<4x1xf32>
    %8 = arith.divf %6, %7 : vector<4x1xf32>
    %9 = vector.broadcast %8 : vector<4x1xf32> to vector<4x32xf32>
    %10 = arith.subf %4, %9 : vector<4x32xf32>
    %11 = arith.mulf %10, %10 : vector<4x32xf32>
    %cst_4 = arith.constant dense<0.000000e+00> : vector<4xf32>
    %12 = vector.multi_reduction <add>, %11, %cst_4 [1] : vector<4x32xf32> to vector<4xf32>
    %13 = vector.shape_cast %12 : vector<4xf32> to vector<4x1xf32>
    %cst_5 = arith.constant 3.100000e+01 : f32
    %14 = vector.broadcast %cst_5 : f32 to vector<4x1xf32>
    %15 = arith.divf %13, %14 : vector<4x1xf32>
    %16 = math.sqrt %15 : vector<4x1xf32>
    %cst_6 = arith.constant 9.99999997E-7 : f32
    %17 = vector.broadcast %cst_6 : f32 to vector<4x1xf32>
    %18 = arith.addf %16, %17 : vector<4x1xf32>
    %cst_7 = arith.constant 1.000000e+00 : f32
    %19 = vector.broadcast %cst_7 : f32 to vector<4x1xf32>
    %20 = arith.divf %19, %18 : vector<4x1xf32>
    %21 = vector.broadcast %20 : vector<4x1xf32> to vector<4x32xf32>
    %22 = arith.mulf %10, %21 : vector<4x32xf32>
    %23 = vector.extract_strided_slice %0 {offsets = [0, 32], sizes = [4, 32], strides = [1, 1]} : vector<4x128xf32> to vector<4x32xf32>
    %cst_8 = arith.constant dense<0.000000e+00> : vector<4xf32>
    %24 = vector.multi_reduction <add>, %23, %cst_8 [1] : vector<4x32xf32> to vector<4xf32>
    %25 = vector.shape_cast %24 : vector<4xf32> to vector<4x1xf32>
    %cst_9 = arith.constant 3.200000e+01 : f32
    %26 = vector.broadcast %cst_9 : f32 to vector<4x1xf32>
    %27 = arith.divf %25, %26 : vector<4x1xf32>
    %28 = vector.broadcast %27 : vector<4x1xf32> to vector<4x32xf32>
    %29 = arith.subf %23, %28 : vector<4x32xf32>
    %30 = arith.mulf %29, %29 : vector<4x32xf32>
    %cst_10 = arith.constant dense<0.000000e+00> : vector<4xf32>
    %31 = vector.multi_reduction <add>, %30, %cst_10 [1] : vector<4x32xf32> to vector<4xf32>
    %32 = vector.shape_cast %31 : vector<4xf32> to vector<4x1xf32>
    %cst_11 = arith.constant 3.100000e+01 : f32
    %33 = vector.broadcast %cst_11 : f32 to vector<4x1xf32>
    %34 = arith.divf %32, %33 : vector<4x1xf32>
    %35 = math.sqrt %34 : vector<4x1xf32>
    %cst_12 = arith.constant 9.99999997E-7 : f32
    %36 = vector.broadcast %cst_12 : f32 to vector<4x1xf32>
    %37 = arith.addf %35, %36 : vector<4x1xf32>
    %cst_13 = arith.constant 1.000000e+00 : f32
    %38 = vector.broadcast %cst_13 : f32 to vector<4x1xf32>
    %39 = arith.divf %38, %37 : vector<4x1xf32>
    %40 = vector.broadcast %39 : vector<4x1xf32> to vector<4x32xf32>
    %41 = arith.mulf %29, %40 : vector<4x32xf32>
    %42 = vector.extract_strided_slice %0 {offsets = [0, 64], sizes = [4, 32], strides = [1, 1]} : vector<4x128xf32> to vector<4x32xf32>
    %cst_14 = arith.constant dense<0.000000e+00> : vector<4xf32>
    %43 = vector.multi_reduction <add>, %42, %cst_14 [1] : vector<4x32xf32> to vector<4xf32>
    %44 = vector.shape_cast %43 : vector<4xf32> to vector<4x1xf32>
    %cst_15 = arith.constant 3.200000e+01 : f32
    %45 = vector.broadcast %cst_15 : f32 to vector<4x1xf32>
    %46 = arith.divf %44, %45 : vector<4x1xf32>
    %47 = vector.broadcast %46 : vector<4x1xf32> to vector<4x32xf32>
    %48 = arith.subf %42, %47 : vector<4x32xf32>
    %49 = arith.mulf %48, %48 : vector<4x32xf32>
    %cst_16 = arith.constant dense<0.000000e+00> : vector<4xf32>
    %50 = vector.multi_reduction <add>, %49, %cst_16 [1] : vector<4x32xf32> to vector<4xf32>
    %51 = vector.shape_cast %50 : vector<4xf32> to vector<4x1xf32>
    %cst_17 = arith.constant 3.100000e+01 : f32
    %52 = vector.broadcast %cst_17 : f32 to vector<4x1xf32>
    %53 = arith.divf %51, %52 : vector<4x1xf32>
    %54 = math.sqrt %53 : vector<4x1xf32>
    %cst_18 = arith.constant 9.99999997E-7 : f32
    %55 = vector.broadcast %cst_18 : f32 to vector<4x1xf32>
    %56 = arith.addf %54, %55 : vector<4x1xf32>
    %cst_19 = arith.constant 1.000000e+00 : f32
    %57 = vector.broadcast %cst_19 : f32 to vector<4x1xf32>
    %58 = arith.divf %57, %56 : vector<4x1xf32>
    %59 = vector.broadcast %58 : vector<4x1xf32> to vector<4x32xf32>
    %60 = arith.mulf %48, %59 : vector<4x32xf32>
    %61 = vector.extract_strided_slice %0 {offsets = [0, 96], sizes = [4, 32], strides = [1, 1]} : vector<4x128xf32> to vector<4x32xf32>
    %cst_20 = arith.constant dense<0.000000e+00> : vector<4xf32>
    %62 = vector.multi_reduction <add>, %61, %cst_20 [1] : vector<4x32xf32> to vector<4xf32>
    %63 = vector.shape_cast %62 : vector<4xf32> to vector<4x1xf32>
    %cst_21 = arith.constant 3.200000e+01 : f32
    %64 = vector.broadcast %cst_21 : f32 to vector<4x1xf32>
    %65 = arith.divf %63, %64 : vector<4x1xf32>
    %66 = vector.broadcast %65 : vector<4x1xf32> to vector<4x32xf32>
    %67 = arith.subf %61, %66 : vector<4x32xf32>
    %68 = arith.mulf %67, %67 : vector<4x32xf32>
    %cst_22 = arith.constant dense<0.000000e+00> : vector<4xf32>
    %69 = vector.multi_reduction <add>, %68, %cst_22 [1] : vector<4x32xf32> to vector<4xf32>
    %70 = vector.shape_cast %69 : vector<4xf32> to vector<4x1xf32>
    %cst_23 = arith.constant 3.100000e+01 : f32
    %71 = vector.broadcast %cst_23 : f32 to vector<4x1xf32>
    %72 = arith.divf %70, %71 : vector<4x1xf32>
    %73 = math.sqrt %72 : vector<4x1xf32>
    %cst_24 = arith.constant 9.99999997E-7 : f32
    %74 = vector.broadcast %cst_24 : f32 to vector<4x1xf32>
    %75 = arith.addf %73, %74 : vector<4x1xf32>
    %cst_25 = arith.constant 1.000000e+00 : f32
    %76 = vector.broadcast %cst_25 : f32 to vector<4x1xf32>
    %77 = arith.divf %76, %75 : vector<4x1xf32>
    %78 = vector.broadcast %77 : vector<4x1xf32> to vector<4x32xf32>
    %79 = arith.mulf %67, %78 : vector<4x32xf32>
    %80 = tpu.concatenate %22, %41, %60, %79 in 1 : vector<4x32xf32>, vector<4x32xf32>, vector<4x32xf32>, vector<4x32xf32> -> vector<4x128xf32>
    %81 = vector.broadcast %2 : vector<1x128xf32> to vector<4x128xf32>
    %82 = arith.mulf %80, %81 : vector<4x128xf32>
    %83 = vector.broadcast %3 : vector<1x128xf32> to vector<4x128xf32>
    %84 = arith.addf %82, %83 : vector<4x128xf32>
    %c0_26 = arith.constant 0 : index
    %c0_27 = arith.constant 0 : index
    %85 = vector.load %arg3[%c0_26, %c0_27] : memref<4x128xf32, #tpu.memory_space<vmem>>, vector<4x128xf32>
    tpu.vector_store %arg3[%c0_26, %c0_27], %84 {strides = array<i32>} : memref<4x128xf32, #tpu.memory_space<vmem>>, vector<4x128xf32>,
    return
  }
  func.func @transform_0(%arg0: i32) -> (i32, i32) {
    %c0_i32 = arith.constant 0 : i32
    %c0_i32_0 = arith.constant 0 : i32
    return %arg0, %c0_i32 : i32, i32
  }
  func.func @transform_1(%arg0: i32) -> (i32, i32) {
    %c0_i32 = arith.constant 0 : i32
    %c0_i32_0 = arith.constant 0 : i32
    %c0_i32_1 = arith.constant 0 : i32
    return %c0_i32, %c0_i32_0 : i32, i32
  }
  func.func @transform_2(%arg0: i32) -> (i32, i32) {
    %c0_i32 = arith.constant 0 : i32
    %c0_i32_0 = arith.constant 0 : i32
    return %arg0, %c0_i32 : i32, i32
  }
}

</mosaic_0001>

<bundles_post_ra>
// kernel: tpu_custom_call.1
= control target key start
LH: loop header
LB: loop body
LE: loop exit
PB: predicated region body
PF: predicated region fallthrough
CT: control target
= control target key end

     0   :  { %7 = vsyncpa [#allocation3], 0  ;;  %s326_s0 = inlined_call_operand.hbm [shape: f32[4,128], index: 0, kind: input, shape index: {}]   ;;  %s327_s1 = inlined_call_operand.hbm [shape: f32[2,128], index: 1, kind: input, shape index: {}]   ;;  %s328_s2 = inlined_call_operand.hbm [shape: f32[4,128], index: 2, kind: output, shape index: {}]  }
   0x1   :  { %8 = vsyncpa [#allocation6], 0 }
   0x2   :  { %9 = vsyncpa [#allocation4], 0  ;;  %s268_s9 = smov [#allocation2]   ;;  %s269_s11 = smov [#allocation5]  }
   0x3   :  { %s16_s10 = sshll.u32 %s268_s9, 4  ;;  %s26_s12 = sshll.u32 %s269_s11, 4  ;;  %s17_s10 = int_to_ptr.vmem [resolvable:$true] %s16_s10  ;;  %s27_s12 = int_to_ptr.vmem [resolvable:$true] %s26_s12 }
   0x4   :  { %s210_s13 = scalar_lea.vmem %s17_s10, 64  ;;  %p215_p1 = scmp.lt.s32.totalorder %s17_s10, %s17_s10 }
   0x5   :  { %p211_p0 = scmp.ne.s32.totalorder %s17_s10, %s210_s13  ;;  %p216_p2 = scmp.lt.s32.totalorder %s210_s13, %s210_s13 }
   0x7   :  { %p217_p3 = por %p216_p2, %p215_p1 }
   0x9   :  { %p218_p4 = pnand %p217_p3, %p211_p0 }
   0xb   :  { %221 = shalt.err (!%p218_p4)
}
   0xc   :  { %19 = dma.hbm_to_vmem [thread:$0]  %s326_s0, 64, %s17_s10, [#allocation3]  }
   0xd   :  { %s230_s16 = scalar_lea.vmem %s27_s12, 32  ;;  %p235_p6 = scmp.lt.s32.totalorder %s27_s12, %s27_s12 }
   0xe   :  { %p231_p5 = scmp.ne.s32.totalorder %s27_s12, %s230_s16  ;;  %p236_p7 = scmp.lt.s32.totalorder %s230_s16, %s230_s16 }
  0x10   :  { %p237_p8 = por %p236_p7, %p235_p6 }
  0x12   :  { %p238_p9 = pnand %p237_p8, %p231_p5 }
  0x14   :  { %241 = shalt.err (!%p238_p9)
}
  0x15   :  { %29 = dma.hbm_to_vmem [thread:$0]  %s327_s1, 32, %s27_s12, [#allocation6]  }
  0x16   :  { %262 = dma.done.wait [#allocation3], 64  }
  0x17   :  { %263 = vsyncadd [#allocation3], 4294967232 }
  0x18   :  { %264 = dma.done.wait [#allocation6], 32  }
  0x19   :  { %265 = vsyncadd [#allocation6], 4294967264  ;;  %v36_v0 = vld [vmem:[#allocation2] sm:$0xf]  ;;  %s270_s19 = smov 96   ;;  %s271_s20 = smov 32   ;;  %v153_v63 = vlaneseq }
  0x1a   :  { %63 = vrot.lane.b32.xlu0 %v36_v0, %s270_s19  ;;  %119 = vrot.lane.b32.xlu1 %v36_v0, %s271_s20  ;;  %s272_s0 = smov 64   ;;  %vm38_vm0 = vcmask 257024   ;;  %vm147_vm9 = vcmask 261120   ;;  %vm149_vm10 = vcmask 523264   ;;  %vm151_vm11 = vcmask 785408   ;;  %s273_s1 = smov [#allocation7]  }
  0x1b   :  { %v39_v3 = vsel %vm38_vm0, %v36_v0, 0.0  ;;  %s170_s21 = sshll.u32 %s273_s1, 4  ;;  %s171_s21 = int_to_ptr.vmem [resolvable:$true] %s170_s21 }
  0x1c   :  { %s242_s22 = scalar_lea.vmem %s171_s21, 64  ;;  %p247_p11 = scmp.lt.s32.totalorder %s171_s21, %s171_s21 }
  0x1d   :  { %p243_p10 = scmp.ne.s32.totalorder %s171_s21, %s242_s22  ;;  %p248_p12 = scmp.lt.s32.totalorder %s242_s22, %s242_s22 }
  0x1e   :  { %91 = vrot.lane.b32.xlu0 %v36_v0, %s272_s0 }
  0x1f   :  { %p249_p13 = por %p248_p12, %p247_p11 }
  0x21   :  { %p250_p0 = pnand %p249_p13, %p243_p10 }
  0x8c   :  { %v64_v1 = vpop.permute.xlu0 %63  ;;  %v120_v5 = vpop.permute.xlu1 %119 }
  0x8d   :  { %v66_v2 = vsel %vm38_vm0, %v64_v1, 0.0  ;;  %v122_v7 = vsel %vm38_vm0, %v120_v5, 0.0  ;;  %v37_v5 = vld [vmem:[#allocation5] sm:$0x3] }
  0x8e   :  { %67 = vadd.xlane.f32.xlu1 %v66_v2 }
  0x90   :  { %v92_v4 = vpop.permute.xlu0 %91 }
  0x91   :  { %v94_v6 = vsel %vm38_vm0, %v92_v4, 0.0 }
  0x92   :  { %95 = vadd.xlane.f32.xlu0 %v94_v6  ;;  %40 = vadd.xlane.f32.xlu1 %v39_v3 }
  0x96   :  { %123 = vadd.xlane.f32.xlu0 %v122_v7 }
 0x117   :  { %v68_v8 = vpop.xlane.xlu1 %67 }
 0x118   :  { %v69_v9 = vmul.f32 0.03125, %v68_v8 }
 0x11a   :  { %v299_v10 = vsub.f32 %v36_v0, %v69_v9 }
 0x11b   :  { %v96_v11 = vpop.xlane.xlu0 %95  ;;  %v41_v20 = vpop.xlane.xlu1 %40 }
 0x11c   :  { %v97_v12 = vmul.f32 0.03125, %v96_v11  ;;  %v71_v13 = vmul.f32 %v299_v10, %v299_v10  ;;  %v43_v21 = vmul.f32 0.03125, %v41_v20 }
 0x11e   :  { %v303_v14 = vsub.f32 %v36_v0, %v97_v12  ;;  %73 = vrot.lane.b32.xlu0 %v71_v13, %s270_s19  ;;  %v311_v22 = vsub.f32 %v36_v0, %v43_v21 }
 0x11f   :  { %v124_v15 = vpop.xlane.xlu0 %123 }
 0x120   :  { %v125_v16 = vmul.f32 0.03125, %v124_v15  ;;  %v99_v17 = vmul.f32 %v303_v14, %v303_v14  ;;  %v45_v23 = vmul.f32 %v311_v22, %v311_v22 }
 0x122   :  { %v307_v18 = vsub.f32 %v36_v0, %v125_v16  ;;  %101 = vrot.lane.b32.xlu1 %v99_v17, %s272_s0  ;;  %v46_v24 = vsel %vm38_vm0, %v45_v23, 0.0  ;;  %v154_v0 = vshrl.u32 %v153_v63, 7 }
 0x124   :  { %v127_v19 = vmul.f32 %v307_v18, %v307_v18  ;;  %v155_v4 = vsub.s32 0, %v154_v0  ;;  %v160_v8 = vsub.s32 1, %v154_v0 }
 0x126   :  { %129 = vrot.lane.b32.xlu1 %v127_v19, %s271_s20  ;;  %v156_v12 = vrot.slane %v37_v5, %v155_v4  ;;  %v161_v17 = vrot.slane %v37_v5, %v160_v8 }
 0x13d   :  { %47 = vadd.xlane.f32.xlu0 %v46_v24 }
 0x190   :  { %v74_v25 = vpop.permute.xlu0 %73 }
 0x191   :  { %v76_v26 = vsel %vm38_vm0, %v74_v25, 0.0 }
 0x192   :  { %77 = vadd.xlane.f32.xlu1 %v76_v26 }
 0x194   :  { %v102_v27 = vpop.permute.xlu1 %101 }
 0x195   :  { %v104_v28 = vsel %vm38_vm0, %v102_v27, 0.0 }
 0x196   :  { %105 = vadd.xlane.f32.xlu0 %v104_v28 }
 0x198   :  { %v130_v29 = vpop.permute.xlu1 %129 }
 0x199   :  { %v132_v30 = vsel %vm38_vm0, %v130_v29, 0.0 }
 0x19a   :  { %133 = vadd.xlane.f32.xlu0 %v132_v30 }
 0x1c6   :  { %v48_v31 = vpop.xlane.xlu0 %47 }
 0x1c7   :  { %v50_v32 = vmul.f32 0.032258064, %v48_v31 }
 0x1c9   :  { %186 = vrsqrt.f32 %v50_v32  ;;  %vm53_vm1 = vcmp.eq.f32.partialorder %v50_v32, inf  ;;  %v56_v41 = vand.u32 2147483648, %v50_v32  ;;  %vm55_vm2 = vcmp.eq.f32.partialorder %v50_v32, 0.0 }
 0x1d6   :  { %v187_v38 = vpop.eup %186 }
 0x1d7   :  { %v52_v40 = vmul.f32 %v187_v38, %v50_v32 }
 0x1d9   :  { %v54_v43 = vsel %vm53_vm1, %v50_v32, %v52_v40 }
 0x1da   :  { %v57_v46 = vsel %vm55_vm2, %v56_v41, %v54_v43 }
 0x1db   :  { %v58_v52 = vadd.f32 1e-06, %v57_v46 }
 0x21b   :  { %v78_v33 = vpop.xlane.xlu1 %77 }
 0x21c   :  { %v79_v34 = vmul.f32 0.032258064, %v78_v33 }
 0x21e   :  { %188 = vrsqrt.f32 %v79_v34  ;;  %vm82_vm3 = vcmp.eq.f32.partialorder %v79_v34, inf  ;;  %v85_v45 = vand.u32 2147483648, %v79_v34  ;;  %vm84_vm4 = vcmp.eq.f32.partialorder %v79_v34, 0.0 }
 0x21f   :  { %v106_v35 = vpop.xlane.xlu0 %105 }
 0x220   :  { %v107_v36 = vmul.f32 0.032258064, %v106_v35 }
 0x222   :  { %190 = vrsqrt.f32 %v107_v36  ;;  %vm110_vm5 = vcmp.eq.f32.partialorder %v107_v36, inf  ;;  %v113_v53 = vand.u32 2147483648, %v107_v36  ;;  %vm112_vm6 = vcmp.eq.f32.partialorder %v107_v36, 0.0 }
 0x223   :  { %v134_v37 = vpop.xlane.xlu0 %133 }
 0x224   :  { %v135_v39 = vmul.f32 0.032258064, %v134_v37 }
 0x226   :  { %192 = vrsqrt.f32 %v135_v39  ;;  %vm138_vm7 = vcmp.eq.f32.partialorder %v135_v39, inf  ;;  %v141_v59 = vand.u32 2147483648, %v135_v39  ;;  %vm140_vm8 = vcmp.eq.f32.partialorder %v135_v39, 0.0 }
 0x22b   :  { %v189_v42 = vpop.eup %188 }
 0x22c   :  { %v81_v44 = vmul.f32 %v189_v42, %v79_v34 }
 0x22e   :  { %v83_v47 = vsel %vm82_vm3, %v79_v34, %v81_v44 }
 0x22f   :  { %v191_v48 = vpop.eup %190  ;;  %v86_v49 = vsel %vm84_vm4, %v85_v45, %v83_v47 }
 0x230   :  { %v87_v50 = vadd.f32 1e-06, %v86_v49  ;;  %v109_v51 = vmul.f32 %v191_v48, %v107_v36 }
 0x232   :  { %v111_v54 = vsel %vm110_vm5, %v107_v36, %v109_v51  ;;  %194 = vrcp.f32 %v87_v50 }
 0x233   :  { %v193_v55 = vpop.eup %192  ;;  %v114_v56 = vsel %vm112_vm6, %v113_v53, %v111_v54  ;;  %196 = vrcp.f32 %v58_v52 }
 0x234   :  { %v115_v57 = vadd.f32 1e-06, %v114_v56  ;;  %v137_v58 = vmul.f32 %v193_v55, %v135_v39 }
 0x236   :  { %198 = vrcp.f32 %v115_v57  ;;  %v139_v60 = vsel %vm138_vm7, %v135_v39, %v137_v58 }
 0x237   :  { %v142_v61 = vsel %vm140_vm8, %v141_v59, %v139_v60 }
 0x238   :  { %v143_v62 = vadd.f32 1e-06, %v142_v61 }
 0x23a   :  { %200 = vrcp.f32 %v143_v62 }
 0x23f   :  { %v195_v1 = vpop.eup %194 }
 0x240   :  { %v197_v2 = vpop.eup %196  ;;  %v90_v6 = vmul.f32 %v195_v1, %v299_v10 }
 0x241   :  { %v61_v9 = vmul.f32 %v197_v2, %v311_v22 }
 0x243   :  { %v199_v3 = vpop.eup %198  ;;  %v148_v15 = vsel %vm147_vm9, %v61_v9, %v90_v6 }
 0x244   :  { %v118_v7 = vmul.f32 %v199_v3, %v303_v14 }
 0x246   :  { %v150_v16 = vsel %vm149_vm10, %v148_v15, %v118_v7 }
 0x247   :  { %v201_v11 = vpop.eup %200 }
 0x248   :  { %v146_v13 = vmul.f32 %v201_v11, %v307_v18 }
 0x24a   :  { %v152_v19 = vsel %vm151_vm11, %v150_v16, %v146_v13 }
 0x24b   :  { %v157_v20 = vmul.f32 %v156_v12, %v152_v19 }
 0x24d   :  { %v162_v10 = vadd.f32 %v161_v17, %v157_v20 }
 0x24f   :  { %163 = vst [vmem:[#allocation7] sm:$0xf] %v162_v10 }
 0x250   :  { %253 = shalt.err (!%p250_p0)
}
 0x251   :  { %173 = dma.vmem_to_hbm [thread:$0]  %s171_s21, 64, %s328_s2, [#allocation4]  }
 0x252   :  { %266 = dma.done.wait [#allocation4], 64  }
 0x253   :  { %267 = vsyncadd [#allocation4], 4294967232 }
 0x254   :  { %177 = vsyncpa [#allocation3], 1 }
 0x255   :  { %178 = vsyncpa [#allocation6], 1 }
 0x256   :  { %179 = vsyncpa [#allocation4], 1 }

</bundles_post_ra>
